<compile_context>
chip_gen: v7x
topology: tpu7x:2x2x1
jax: 0.10.0
libtpu: 0.0.40
codegen_flags: <defaults>
</compile_context>

<pallas_src>
import jax
import jax.numpy as jnp
from jax import lax
from jax.experimental import pallas as pl
from jax.experimental.pallas import tpu as pltpu


def lm_kernel(ids_ref, emb_ref, w_ih_ref, w_hh_ref, b_ref, w_out_ref, b_out_ref,
              logits_ref):
    """Fused gather -> batched input projection -> unrolled LSTM -> batched output proj."""
    H = w_hh_ref.shape[0]
    seq = logits_ref.shape[0]

    # 1) Fused embedding gather: scalar ids from SMEM, dynamic row loads from VMEM,
    #    then ONE hoisted (seq,H)@(H,4H) MXU matmul for ALL steps' input projections.
    rows = [emb_ref[pl.ds(ids_ref[t], 1), :] for t in range(seq)]
    embeds = jnp.concatenate(rows, axis=0)                                  # (seq, H)
    gates_in = (jnp.dot(embeds, w_ih_ref[...], preferred_element_type=jnp.float32)
                + b_ref[...])                                               # (seq, 4H) = one f32 vreg

    # 2) Serial recurrence: only h @ W_hh per step; h/c carried in registers,
    #    W_hh load hoisted out of the loop. seq is small & static -> static unroll.
    w_hh = w_hh_ref[...]
    h = jnp.zeros((1, H), jnp.float32)
    c = jnp.zeros((1, H), jnp.float32)
    hs = []
    for t in range(seq):
        # TODO(synk): for large H, stage W_hh once via pltpu.matmul_push_rhs (v7x MRB) or
        # use a VPU broadcast-MAC to shave the per-step 1-row MXU round trip.
        gates = gates_in[t:t + 1, :] + jnp.dot(h, w_hh,
                                               preferred_element_type=jnp.float32)  # (1, 4H)
        # Whole-vreg activations: 2 EUP pushes for all four gates.
        # sigmoid in tanh form (exact identity) -> guaranteed single EUP op on v5e too.
        sig = 0.5 * (jnp.tanh(0.5 * gates) + 1.0)       # [sig(i)|sig(f)|sig(g)|sig(o)]
        tnh = jnp.tanh(gates)                           # tanh of all gates
        # TODO(synk): i/f/g/o alignment could use pltpu.roll (XLU slot) instead of static
        # lane slices if the VPU select work ever shows on the serial critical path.
        i_g = sig[:, 0:H]
        f_g = sig[:, H:2 * H]
        g_g = tnh[:, 2 * H:3 * H]
        o_g = sig[:, 3 * H:4 * H]

        c = f_g * c + i_g * g_g
        h = o_g * jnp.tanh(c)
        hs.append(h)

    # 3) Dropout(p=0) is identity; ONE batched output projection with a lane-dense
    #    (seq, V_pad) store (V_pad is a 128 multiple -> full unmasked vst).
    h_all = jnp.concatenate(hs, axis=0)                                     # (seq, H)
    logits_ref[...] = (jnp.dot(h_all, w_out_ref[...],
                               preferred_element_type=jnp.float32)
                       + b_out_ref[...])


def language_model_forward(x_ids, params):
    """x_ids: int32 (seq,). Returns logits (seq, 1, vocab) matching PyTorch output."""
    embedding = params["embedding"]            # (V, H)
    w_ih = params["w_ih"]                      # (H, 4H)
    w_hh = params["w_hh"]                      # (H, 4H)
    bias = params["bias"]                      # (1, 4H)
    w_out = params["w_out"]                    # (H, V)
    b_out = params["b_out"]                    # (1, V)

    seq = x_ids.shape[0]
    H = w_hh.shape[0]
    V = w_out.shape[1]

    # Lane-dense output: zero-pad V to a 128 multiple (padded lanes are zeroed so no
    # garbage leaks); slice the padding back off after the call.
    V_pad = max(128, pl.cdiv(V, 128) * 128)
    if V_pad != V:
        w_out = jnp.pad(w_out, ((0, 0), (0, V_pad - V)))
        b_out = jnp.pad(b_out, ((0, 0), (0, V_pad - V)))

    smem = pl.BlockSpec(memory_space=pltpu.MemorySpace.SMEM)
    vmem = pl.BlockSpec(memory_space=pltpu.MemorySpace.VMEM)

    logits_pad = pl.pallas_call(
        lm_kernel,
        out_shape=jax.ShapeDtypeStruct((seq, V_pad), jnp.float32),
        in_specs=[smem, vmem, vmem, vmem, vmem, vmem, vmem],
        out_specs=vmem,
        # TODO(synk): at production sizes, add a V grid axis (128-multiple tiles, bf16
        # W_out, dimension_semantics=("parallel",)) sized for v7x's 64 MiB VMEM.
    )(x_ids.astype(jnp.int32), embedding, w_ih, w_hh, bias, w_out, b_out)

    return logits_pad[:, :V].reshape(seq, 1, V)


def _reference_forward(x_ids, params):
    """Pure-JAX reference of the same math for correctness check."""
    embedding = params["embedding"]
    w_ih, w_hh, bias = params["w_ih"], params["w_hh"], params["bias"]
    w_out, b_out = params["w_out"], params["b_out"]
    H = w_hh.shape[0]
    embeds = jnp.take(embedding, x_ids, axis=0)

    def step(carry, x_t):
        h, c = carry
        gates = x_t[None, :] @ w_ih + h @ w_hh + bias
        i = jax.nn.sigmoid(gates[:, 0:H])
        f = jax.nn.sigmoid(gates[:, H:2 * H])
        g = jnp.tanh(gates[:, 2 * H:3 * H])
        o = jax.nn.sigmoid(gates[:, 3 * H:4 * H])
        c = f * c + i * g
        h = o * jnp.tanh(c)
        return (h, c), (h @ w_out + b_out)[0]

    h0 = jnp.zeros((1, H), jnp.float32)
    c0 = jnp.zeros((1, H), jnp.float32)
    _, logits = lax.scan(step, (h0, c0), embeds)
    return logits[:, None, :]


def init_params(key, vocab_size, rnn_size):
    ks = jax.random.split(key, 7)
    H, V = rnn_size, vocab_size
    s = 1.0 / jnp.sqrt(jnp.float32(H))
    params = {
        "embedding": jax.random.normal(ks[0], (V, H), jnp.float32),
        # stored transposed relative to PyTorch (input, 4*hidden), gate order i|f|g|o
        "w_ih": jax.random.uniform(ks[1], (H, 4 * H), jnp.float32, -s, s),
        "w_hh": jax.random.uniform(ks[2], (H, 4 * H), jnp.float32, -s, s),
        "bias": (jax.random.uniform(ks[3], (1, 4 * H), jnp.float32, -s, s)
                 + jax.random.uniform(ks[4], (1, 4 * H), jnp.float32, -s, s)),
        "w_out": jax.random.uniform(ks[5], (H, V), jnp.float32, -s, s),
        "b_out": jax.random.uniform(ks[6], (1, V), jnp.float32, -s, s),
    }
    return params


if __name__ == "__main__":
    vocab_size = 64
    rnn_size = 32
    seq_len = 8

    key = jax.random.PRNGKey(0)
    k_param, k_tok = jax.random.split(key)
    params = init_params(k_param, vocab_size, rnn_size)
    x_ids = jax.random.randint(k_tok, (seq_len,), 0, vocab_size, dtype=jnp.int32)

    logits = language_model_forward(x_ids, params)
    jax.block_until_ready(logits)

    ref = _reference_forward(x_ids, params)
    assert logits.shape == (seq_len, 1, vocab_size), logits.shape
    assert jnp.allclose(logits, ref, atol=1e-4, rtol=1e-4), "mismatch vs reference"

    print("KERNEL_OK")
</pallas_src>

<mosaic_0001>
module attributes {stable_mosaic.version = 11 : i64} {
  func.func @lm_kernel(%arg0: memref<8xi32, #tpu.memory_space<smem>>, %arg1: memref<64x32xf32, #tpu.memory_space<vmem>>, %arg2: memref<32x128xf32, #tpu.memory_space<vmem>>, %arg3: memref<32x128xf32, #tpu.memory_space<vmem>>, %arg4: memref<1x128xf32, #tpu.memory_space<vmem>>, %arg5: memref<32x128xf32, #tpu.memory_space<vmem>>, %arg6: memref<1x128xf32, #tpu.memory_space<vmem>>, %arg7: memref<8x128xf32, #tpu.memory_space<vmem>>) attributes {dimension_semantics = [], scalar_prefetch = 0 : i64, scratch_operands = 0 : i64, tpu.core_type = #tpu.core_type<tc>} {
    %c0 = arith.constant 0 : index
    %0 = memref.load %arg0[%c0] : memref<8xi32, #tpu.memory_space<smem>>
    %1 = arith.index_cast %0 : i32 to index
    %c0_0 = arith.constant 0 : index
    %2 = vector.load %arg1[%1, %c0_0] : memref<64x32xf32, #tpu.memory_space<vmem>>, vector<1x32xf32>
    %c1 = arith.constant 1 : index
    %3 = memref.load %arg0[%c1] : memref<8xi32, #tpu.memory_space<smem>>
    %4 = arith.index_cast %3 : i32 to index
    %c0_1 = arith.constant 0 : index
    %5 = vector.load %arg1[%4, %c0_1] : memref<64x32xf32, #tpu.memory_space<vmem>>, vector<1x32xf32>
    %c2 = arith.constant 2 : index
    %6 = memref.load %arg0[%c2] : memref<8xi32, #tpu.memory_space<smem>>
    %7 = arith.index_cast %6 : i32 to index
    %c0_2 = arith.constant 0 : index
    %8 = vector.load %arg1[%7, %c0_2] : memref<64x32xf32, #tpu.memory_space<vmem>>, vector<1x32xf32>
    %c3 = arith.constant 3 : index
    %9 = memref.load %arg0[%c3] : memref<8xi32, #tpu.memory_space<smem>>
    %10 = arith.index_cast %9 : i32 to index
    %c0_3 = arith.constant 0 : index
    %11 = vector.load %arg1[%10, %c0_3] : memref<64x32xf32, #tpu.memory_space<vmem>>, vector<1x32xf32>
    %c4 = arith.constant 4 : index
    %12 = memref.load %arg0[%c4] : memref<8xi32, #tpu.memory_space<smem>>
    %13 = arith.index_cast %12 : i32 to index
    %c0_4 = arith.constant 0 : index
    %14 = vector.load %arg1[%13, %c0_4] : memref<64x32xf32, #tpu.memory_space<vmem>>, vector<1x32xf32>
    %c5 = arith.constant 5 : index
    %15 = memref.load %arg0[%c5] : memref<8xi32, #tpu.memory_space<smem>>
    %16 = arith.index_cast %15 : i32 to index
    %c0_5 = arith.constant 0 : index
    %17 = vector.load %arg1[%16, %c0_5] : memref<64x32xf32, #tpu.memory_space<vmem>>, vector<1x32xf32>
    %c6 = arith.constant 6 : index
    %18 = memref.load %arg0[%c6] : memref<8xi32, #tpu.memory_space<smem>>
    %19 = arith.index_cast %18 : i32 to index
    %c0_6 = arith.constant 0 : index
    %20 = vector.load %arg1[%19, %c0_6] : memref<64x32xf32, #tpu.memory_space<vmem>>, vector<1x32xf32>
    %c7 = arith.constant 7 : index
    %21 = memref.load %arg0[%c7] : memref<8xi32, #tpu.memory_space<smem>>
    %22 = arith.index_cast %21 : i32 to index
    %c0_7 = arith.constant 0 : index
    %23 = vector.load %arg1[%22, %c0_7] : memref<64x32xf32, #tpu.memory_space<vmem>>, vector<1x32xf32>
    %24 = tpu.concatenate %2, %5, %8, %11, %14, %17, %20, %23 in 0 : vector<1x32xf32>, vector<1x32xf32>, vector<1x32xf32>, vector<1x32xf32>, vector<1x32xf32>, vector<1x32xf32>, vector<1x32xf32>, vector<1x32xf32> -> vector<8x32xf32>
    %c0_8 = arith.constant 0 : index
    %c0_9 = arith.constant 0 : index
    %25 = vector.load %arg2[%c0_8, %c0_9] : memref<32x128xf32, #tpu.memory_space<vmem>>, vector<32x128xf32>
    %cst = arith.constant dense<0.000000e+00> : vector<8x128xf32>
    %26 = tpu.matmul %24, %25, %cst {dimension_numbers = #tpu.dot_dimension_numbers<[1], [0], [0], [1], [0, 0, 1, 1], [], []>} : vector<8x32xf32>, vector<32x128xf32>, vector<8x128xf32> -> vector<8x128xf32>
    %c0_10 = arith.constant 0 : index
    %c0_11 = arith.constant 0 : index
    %27 = vector.load %arg4[%c0_10, %c0_11] : memref<1x128xf32, #tpu.memory_space<vmem>>, vector<1x128xf32>
    %28 = vector.broadcast %27 : vector<1x128xf32> to vector<8x128xf32>
    %29 = arith.addf %26, %28 : vector<8x128xf32>
    %c0_12 = arith.constant 0 : index
    %c0_13 = arith.constant 0 : index
    %30 = vector.load %arg3[%c0_12, %c0_13] : memref<32x128xf32, #tpu.memory_space<vmem>>, vector<32x128xf32>
    %cst_14 = arith.constant 0.000000e+00 : f32
    %31 = vector.broadcast %cst_14 : f32 to vector<1x32xf32>
    %cst_15 = arith.constant 0.000000e+00 : f32
    %32 = vector.broadcast %cst_15 : f32 to vector<1x32xf32>
    %33 = vector.extract_strided_slice %29 {offsets = [0, 0], sizes = [1, 128], strides = [1, 1]} : vector<8x128xf32> to vector<1x128xf32>
    %cst_16 = arith.constant dense<0.000000e+00> : vector<1x128xf32>
    %34 = tpu.matmul %31, %30, %cst_16 {dimension_numbers = #tpu.dot_dimension_numbers<[1], [0], [0], [1], [0, 0, 1, 1], [], []>} : vector<1x32xf32>, vector<32x128xf32>, vector<1x128xf32> -> vector<1x128xf32>
    %35 = arith.addf %33, %34 : vector<1x128xf32>
    %cst_17 = arith.constant 5.000000e-01 : f32
    %36 = vector.broadcast %cst_17 : f32 to vector<1x128xf32>
    %37 = arith.mulf %36, %35 : vector<1x128xf32>
    %38 = math.tanh %37 : vector<1x128xf32>
    %cst_18 = arith.constant 1.000000e+00 : f32
    %39 = vector.broadcast %cst_18 : f32 to vector<1x128xf32>
    %40 = arith.addf %38, %39 : vector<1x128xf32>
    %cst_19 = arith.constant 5.000000e-01 : f32
    %41 = vector.broadcast %cst_19 : f32 to vector<1x128xf32>
    %42 = arith.mulf %41, %40 : vector<1x128xf32>
    %43 = math.tanh %35 : vector<1x128xf32>
    %44 = vector.extract_strided_slice %42 {offsets = [0, 0], sizes = [1, 32], strides = [1, 1]} : vector<1x128xf32> to vector<1x32xf32>
    %45 = vector.extract_strided_slice %42 {offsets = [0, 32], sizes = [1, 32], strides = [1, 1]} : vector<1x128xf32> to vector<1x32xf32>
    %46 = vector.extract_strided_slice %43 {offsets = [0, 64], sizes = [1, 32], strides = [1, 1]} : vector<1x128xf32> to vector<1x32xf32>
    %47 = vector.extract_strided_slice %42 {offsets = [0, 96], sizes = [1, 32], strides = [1, 1]} : vector<1x128xf32> to vector<1x32xf32>
    %48 = arith.mulf %45, %32 : vector<1x32xf32>
    %49 = arith.mulf %44, %46 : vector<1x32xf32>
    %50 = arith.addf %48, %49 : vector<1x32xf32>
    %51 = math.tanh %50 : vector<1x32xf32>
    %52 = arith.mulf %47, %51 : vector<1x32xf32>
    %53 = vector.extract_strided_slice %29 {offsets = [1, 0], sizes = [1, 128], strides = [1, 1]} : vector<8x128xf32> to vector<1x128xf32>
    %cst_20 = arith.constant dense<0.000000e+00> : vector<1x128xf32>
    %54 = tpu.matmul %52, %30, %cst_20 {dimension_numbers = #tpu.dot_dimension_numbers<[1], [0], [0], [1], [0, 0, 1, 1], [], []>} : vector<1x32xf32>, vector<32x128xf32>, vector<1x128xf32> -> vector<1x128xf32>
    %55 = arith.addf %53, %54 : vector<1x128xf32>
    %cst_21 = arith.constant 5.000000e-01 : f32
    %56 = vector.broadcast %cst_21 : f32 to vector<1x128xf32>
    %57 = arith.mulf %56, %55 : vector<1x128xf32>
    %58 = math.tanh %57 : vector<1x128xf32>
    %cst_22 = arith.constant 1.000000e+00 : f32
    %59 = vector.broadcast %cst_22 : f32 to vector<1x128xf32>
    %60 = arith.addf %58, %59 : vector<1x128xf32>
    %cst_23 = arith.constant 5.000000e-01 : f32
    %61 = vector.broadcast %cst_23 : f32 to vector<1x128xf32>
    %62 = arith.mulf %61, %60 : vector<1x128xf32>
    %63 = math.tanh %55 : vector<1x128xf32>
    %64 = vector.extract_strided_slice %62 {offsets = [0, 0], sizes = [1, 32], strides = [1, 1]} : vector<1x128xf32> to vector<1x32xf32>
    %65 = vector.extract_strided_slice %62 {offsets = [0, 32], sizes = [1, 32], strides = [1, 1]} : vector<1x128xf32> to vector<1x32xf32>
    %66 = vector.extract_strided_slice %63 {offsets = [0, 64], sizes = [1, 32], strides = [1, 1]} : vector<1x128xf32> to vector<1x32xf32>
    %67 = vector.extract_strided_slice %62 {offsets = [0, 96], sizes = [1, 32], strides = [1, 1]} : vector<1x128xf32> to vector<1x32xf32>
    %68 = arith.mulf %65, %50 : vector<1x32xf32>
    %69 = arith.mulf %64, %66 : vector<1x32xf32>
    %70 = arith.addf %68, %69 : vector<1x32xf32>
    %71 = math.tanh %70 : vector<1x32xf32>
    %72 = arith.mulf %67, %71 : vector<1x32xf32>
    %73 = vector.extract_strided_slice %29 {offsets = [2, 0], sizes = [1, 128], strides = [1, 1]} : vector<8x128xf32> to vector<1x128xf32>
    %cst_24 = arith.constant dense<0.000000e+00> : vector<1x128xf32>
    %74 = tpu.matmul %72, %30, %cst_24 {dimension_numbers = #tpu.dot_dimension_numbers<[1], [0], [0], [1], [0, 0, 1, 1], [], []>} : vector<1x32xf32>, vector<32x128xf32>, vector<1x128xf32> -> vector<1x128xf32>
    %75 = arith.addf %73, %74 : vector<1x128xf32>
    %cst_25 = arith.constant 5.000000e-01 : f32
    %76 = vector.broadcast %cst_25 : f32 to vector<1x128xf32>
    %77 = arith.mulf %76, %75 : vector<1x128xf32>
    %78 = math.tanh %77 : vector<1x128xf32>
    %cst_26 = arith.constant 1.000000e+00 : f32
    %79 = vector.broadcast %cst_26 : f32 to vector<1x128xf32>
    %80 = arith.addf %78, %79 : vector<1x128xf32>
    %cst_27 = arith.constant 5.000000e-01 : f32
    %81 = vector.broadcast %cst_27 : f32 to vector<1x128xf32>
    %82 = arith.mulf %81, %80 : vector<1x128xf32>
    %83 = math.tanh %75 : vector<1x128xf32>
    %84 = vector.extract_strided_slice %82 {offsets = [0, 0], sizes = [1, 32], strides = [1, 1]} : vector<1x128xf32> to vector<1x32xf32>
    %85 = vector.extract_strided_slice %82 {offsets = [0, 32], sizes = [1, 32], strides = [1, 1]} : vector<1x128xf32> to vector<1x32xf32>
    %86 = vector.extract_strided_slice %83 {offsets = [0, 64], sizes = [1, 32], strides = [1, 1]} : vector<1x128xf32> to vector<1x32xf32>
    %87 = vector.extract_strided_slice %82 {offsets = [0, 96], sizes = [1, 32], strides = [1, 1]} : vector<1x128xf32> to vector<1x32xf32>
    %88 = arith.mulf %85, %70 : vector<1x32xf32>
    %89 = arith.mulf %84, %86 : vector<1x32xf32>
    %90 = arith.addf %88, %89 : vector<1x32xf32>
    %91 = math.tanh %90 : vector<1x32xf32>
    %92 = arith.mulf %87, %91 : vector<1x32xf32>
    %93 = vector.extract_strided_slice %29 {offsets = [3, 0], sizes = [1, 128], strides = [1, 1]} : vector<8x128xf32> to vector<1x128xf32>
    %cst_28 = arith.constant dense<0.000000e+00> : vector<1x128xf32>
    %94 = tpu.matmul %92, %30, %cst_28 {dimension_numbers = #tpu.dot_dimension_numbers<[1], [0], [0], [1], [0, 0, 1, 1], [], []>} : vector<1x32xf32>, vector<32x128xf32>, vector<1x128xf32> -> vector<1x128xf32>
    %95 = arith.addf %93, %94 : vector<1x128xf32>
    %cst_29 = arith.constant 5.000000e-01 : f32
    %96 = vector.broadcast %cst_29 : f32 to vector<1x128xf32>
    %97 = arith.mulf %96, %95 : vector<1x128xf32>
    %98 = math.tanh %97 : vector<1x128xf32>
    %cst_30 = arith.constant 1.000000e+00 : f32
    %99 = vector.broadcast %cst_30 : f32 to vector<1x128xf32>
    %100 = arith.addf %98, %99 : vector<1x128xf32>
    %cst_31 = arith.constant 5.000000e-01 : f32
    %101 = vector.broadcast %cst_31 : f32 to vector<1x128xf32>
    %102 = arith.mulf %101, %100 : vector<1x128xf32>
    %103 = math.tanh %95 : vector<1x128xf32>
    %104 = vector.extract_strided_slice %102 {offsets = [0, 0], sizes = [1, 32], strides = [1, 1]} : vector<1x128xf32> to vector<1x32xf32>
    %105 = vector.extract_strided_slice %102 {offsets = [0, 32], sizes = [1, 32], strides = [1, 1]} : vector<1x128xf32> to vector<1x32xf32>
    %106 = vector.extract_strided_slice %103 {offsets = [0, 64], sizes = [1, 32], strides = [1, 1]} : vector<1x128xf32> to vector<1x32xf32>
    %107 = vector.extract_strided_slice %102 {offsets = [0, 96], sizes = [1, 32], strides = [1, 1]} : vector<1x128xf32> to vector<1x32xf32>
    %108 = arith.mulf %105, %90 : vector<1x32xf32>
    %109 = arith.mulf %104, %106 : vector<1x32xf32>
    %110 = arith.addf %108, %109 : vector<1x32xf32>
    %111 = math.tanh %110 : vector<1x32xf32>
    %112 = arith.mulf %107, %111 : vector<1x32xf32>
    %113 = vector.extract_strided_slice %29 {offsets = [4, 0], sizes = [1, 128], strides = [1, 1]} : vector<8x128xf32> to vector<1x128xf32>
    %cst_32 = arith.constant dense<0.000000e+00> : vector<1x128xf32>
    %114 = tpu.matmul %112, %30, %cst_32 {dimension_numbers = #tpu.dot_dimension_numbers<[1], [0], [0], [1], [0, 0, 1, 1], [], []>} : vector<1x32xf32>, vector<32x128xf32>, vector<1x128xf32> -> vector<1x128xf32>
    %115 = arith.addf %113, %114 : vector<1x128xf32>
    %cst_33 = arith.constant 5.000000e-01 : f32
    %116 = vector.broadcast %cst_33 : f32 to vector<1x128xf32>
    %117 = arith.mulf %116, %115 : vector<1x128xf32>
    %118 = math.tanh %117 : vector<1x128xf32>
    %cst_34 = arith.constant 1.000000e+00 : f32
    %119 = vector.broadcast %cst_34 : f32 to vector<1x128xf32>
    %120 = arith.addf %118, %119 : vector<1x128xf32>
    %cst_35 = arith.constant 5.000000e-01 : f32
    %121 = vector.broadcast %cst_35 : f32 to vector<1x128xf32>
    %122 = arith.mulf %121, %120 : vector<1x128xf32>
    %123 = math.tanh %115 : vector<1x128xf32>
    %124 = vector.extract_strided_slice %122 {offsets = [0, 0], sizes = [1, 32], strides = [1, 1]} : vector<1x128xf32> to vector<1x32xf32>
    %125 = vector.extract_strided_slice %122 {offsets = [0, 32], sizes = [1, 32], strides = [1, 1]} : vector<1x128xf32> to vector<1x32xf32>
    %126 = vector.extract_strided_slice %123 {offsets = [0, 64], sizes = [1, 32], strides = [1, 1]} : vector<1x128xf32> to vector<1x32xf32>
    %127 = vector.extract_strided_slice %122 {offsets = [0, 96], sizes = [1, 32], strides = [1, 1]} : vector<1x128xf32> to vector<1x32xf32>
    %128 = arith.mulf %125, %110 : vector<1x32xf32>
    %129 = arith.mulf %124, %126 : vector<1x32xf32>
    %130 = arith.addf %128, %129 : vector<1x32xf32>
    %131 = math.tanh %130 : vector<1x32xf32>
    %132 = arith.mulf %127, %131 : vector<1x32xf32>
    %133 = vector.extract_strided_slice %29 {offsets = [5, 0], sizes = [1, 128], strides = [1, 1]} : vector<8x128xf32> to vector<1x128xf32>
    %cst_36 = arith.constant dense<0.000000e+00> : vector<1x128xf32>
    %134 = tpu.matmul %132, %30, %cst_36 {dimension_numbers = #tpu.dot_dimension_numbers<[1], [0], [0], [1], [0, 0, 1, 1], [], []>} : vector<1x32xf32>, vector<32x128xf32>, vector<1x128xf32> -> vector<1x128xf32>
    %135 = arith.addf %133, %134 : vector<1x128xf32>
    %cst_37 = arith.constant 5.000000e-01 : f32
    %136 = vector.broadcast %cst_37 : f32 to vector<1x128xf32>
    %137 = arith.mulf %136, %135 : vector<1x128xf32>
    %138 = math.tanh %137 : vector<1x128xf32>
    %cst_38 = arith.constant 1.000000e+00 : f32
    %139 = vector.broadcast %cst_38 : f32 to vector<1x128xf32>
    %140 = arith.addf %138, %139 : vector<1x128xf32>
    %cst_39 = arith.constant 5.000000e-01 : f32
    %141 = vector.broadcast %cst_39 : f32 to vector<1x128xf32>
    %142 = arith.mulf %141, %140 : vector<1x128xf32>
    %143 = math.tanh %135 : vector<1x128xf32>
    %144 = vector.extract_strided_slice %142 {offsets = [0, 0], sizes = [1, 32], strides = [1, 1]} : vector<1x128xf32> to vector<1x32xf32>
    %145 = vector.extract_strided_slice %142 {offsets = [0, 32], sizes = [1, 32], strides = [1, 1]} : vector<1x128xf32> to vector<1x32xf32>
    %146 = vector.extract_strided_slice %143 {offsets = [0, 64], sizes = [1, 32], strides = [1, 1]} : vector<1x128xf32> to vector<1x32xf32>
    %147 = vector.extract_strided_slice %142 {offsets = [0, 96], sizes = [1, 32], strides = [1, 1]} : vector<1x128xf32> to vector<1x32xf32>
    %148 = arith.mulf %145, %130 : vector<1x32xf32>
    %149 = arith.mulf %144, %146 : vector<1x32xf32>
    %150 = arith.addf %148, %149 : vector<1x32xf32>
    %151 = math.tanh %150 : vector<1x32xf32>
    %152 = arith.mulf %147, %151 : vector<1x32xf32>
    %153 = vector.extract_strided_slice %29 {offsets = [6, 0], sizes = [1, 128], strides = [1, 1]} : vector<8x128xf32> to vector<1x128xf32>
    %cst_40 = arith.constant dense<0.000000e+00> : vector<1x128xf32>
    %154 = tpu.matmul %152, %30, %cst_40 {dimension_numbers = #tpu.dot_dimension_numbers<[1], [0], [0], [1], [0, 0, 1, 1], [], []>} : vector<1x32xf32>, vector<32x128xf32>, vector<1x128xf32> -> vector<1x128xf32>
    %155 = arith.addf %153, %154 : vector<1x128xf32>
    %cst_41 = arith.constant 5.000000e-01 : f32
    %156 = vector.broadcast %cst_41 : f32 to vector<1x128xf32>
    %157 = arith.mulf %156, %155 : vector<1x128xf32>
    %158 = math.tanh %157 : vector<1x128xf32>
    %cst_42 = arith.constant 1.000000e+00 : f32
    %159 = vector.broadcast %cst_42 : f32 to vector<1x128xf32>
    %160 = arith.addf %158, %159 : vector<1x128xf32>
    %cst_43 = arith.constant 5.000000e-01 : f32
    %161 = vector.broadcast %cst_43 : f32 to vector<1x128xf32>
    %162 = arith.mulf %161, %160 : vector<1x128xf32>
    %163 = math.tanh %155 : vector<1x128xf32>
    %164 = vector.extract_strided_slice %162 {offsets = [0, 0], sizes = [1, 32], strides = [1, 1]} : vector<1x128xf32> to vector<1x32xf32>
    %165 = vector.extract_strided_slice %162 {offsets = [0, 32], sizes = [1, 32], strides = [1, 1]} : vector<1x128xf32> to vector<1x32xf32>
    %166 = vector.extract_strided_slice %163 {offsets = [0, 64], sizes = [1, 32], strides = [1, 1]} : vector<1x128xf32> to vector<1x32xf32>
    %167 = vector.extract_strided_slice %162 {offsets = [0, 96], sizes = [1, 32], strides = [1, 1]} : vector<1x128xf32> to vector<1x32xf32>
    %168 = arith.mulf %165, %150 : vector<1x32xf32>
    %169 = arith.mulf %164, %166 : vector<1x32xf32>
    %170 = arith.addf %168, %169 : vector<1x32xf32>
    %171 = math.tanh %170 : vector<1x32xf32>
    %172 = arith.mulf %167, %171 : vector<1x32xf32>
    %173 = vector.extract_strided_slice %29 {offsets = [7, 0], sizes = [1, 128], strides = [1, 1]} : vector<8x128xf32> to vector<1x128xf32>
    %cst_44 = arith.constant dense<0.000000e+00> : vector<1x128xf32>
    %174 = tpu.matmul %172, %30, %cst_44 {dimension_numbers = #tpu.dot_dimension_numbers<[1], [0], [0], [1], [0, 0, 1, 1], [], []>} : vector<1x32xf32>, vector<32x128xf32>, vector<1x128xf32> -> vector<1x128xf32>
    %175 = arith.addf %173, %174 : vector<1x128xf32>
    %cst_45 = arith.constant 5.000000e-01 : f32
    %176 = vector.broadcast %cst_45 : f32 to vector<1x128xf32>
    %177 = arith.mulf %176, %175 : vector<1x128xf32>
    %178 = math.tanh %177 : vector<1x128xf32>
    %cst_46 = arith.constant 1.000000e+00 : f32
    %179 = vector.broadcast %cst_46 : f32 to vector<1x128xf32>
    %180 = arith.addf %178, %179 : vector<1x128xf32>
    %cst_47 = arith.constant 5.000000e-01 : f32
    %181 = vector.broadcast %cst_47 : f32 to vector<1x128xf32>
    %182 = arith.mulf %181, %180 : vector<1x128xf32>
    %183 = math.tanh %175 : vector<1x128xf32>
    %184 = vector.extract_strided_slice %182 {offsets = [0, 0], sizes = [1, 32], strides = [1, 1]} : vector<1x128xf32> to vector<1x32xf32>
    %185 = vector.extract_strided_slice %182 {offsets = [0, 32], sizes = [1, 32], strides = [1, 1]} : vector<1x128xf32> to vector<1x32xf32>
    %186 = vector.extract_strided_slice %183 {offsets = [0, 64], sizes = [1, 32], strides = [1, 1]} : vector<1x128xf32> to vector<1x32xf32>
    %187 = vector.extract_strided_slice %182 {offsets = [0, 96], sizes = [1, 32], strides = [1, 1]} : vector<1x128xf32> to vector<1x32xf32>
    %188 = arith.mulf %185, %170 : vector<1x32xf32>
    %189 = arith.mulf %184, %186 : vector<1x32xf32>
    %190 = arith.addf %188, %189 : vector<1x32xf32>
    %191 = math.tanh %190 : vector<1x32xf32>
    %192 = arith.mulf %187, %191 : vector<1x32xf32>
    %193 = tpu.concatenate %52, %72, %92, %112, %132, %152, %172, %192 in 0 : vector<1x32xf32>, vector<1x32xf32>, vector<1x32xf32>, vector<1x32xf32>, vector<1x32xf32>, vector<1x32xf32>, vector<1x32xf32>, vector<1x32xf32> -> vector<8x32xf32>
    %c0_48 = arith.constant 0 : index
    %c0_49 = arith.constant 0 : index
    %194 = vector.load %arg5[%c0_48, %c0_49] : memref<32x128xf32, #tpu.memory_space<vmem>>, vector<32x128xf32>
    %cst_50 = arith.constant dense<0.000000e+00> : vector<8x128xf32>
    %195 = tpu.matmul %193, %194, %cst_50 {dimension_numbers = #tpu.dot_dimension_numbers<[1], [0], [0], [1], [0, 0, 1, 1], [], []>} : vector<8x32xf32>, vector<32x128xf32>, vector<8x128xf32> -> vector<8x128xf32>
    %c0_51 = arith.constant 0 : index
    %c0_52 = arith.constant 0 : index
    %196 = vector.load %arg6[%c0_51, %c0_52] : memref<1x128xf32, #tpu.memory_space<vmem>>, vector<1x128xf32>
    %197 = vector.broadcast %196 : vector<1x128xf32> to vector<8x128xf32>
    %198 = arith.addf %195, %197 : vector<8x128xf32>
    %c0_53 = arith.constant 0 : index
    %c0_54 = arith.constant 0 : index
    %199 = vector.load %arg7[%c0_53, %c0_54] : memref<8x128xf32, #tpu.memory_space<vmem>>, vector<8x128xf32>
    tpu.vector_store %arg7[%c0_53, %c0_54], %198 {strides = array<i32>} : memref<8x128xf32, #tpu.memory_space<vmem>>, vector<8x128xf32>,
    return
  }
}

</mosaic_0001>

<bundles_post_ra>
// kernel: tpu_custom_call.1
= control target key start
LH: loop header
LB: loop body
LE: loop exit
PB: predicated region body
PF: predicated region fallthrough
CT: control target
= control target key end

     0   :  { %12 = vsyncpa [#allocation4], 0  ;;  %s1732_s0 = inlined_call_operand.hbm [shape: s32[8], index: 0, kind: input, shape index: {}]   ;;  %s1733_s1 = inlined_call_operand.vmem [shape: f32[64,32], index: 1, kind: input, shape index: {}]   ;;  %s1734_s2 = inlined_call_operand.vmem [shape: f32[32,128], index: 2, kind: input, shape index: {}]   ;;  %s1735_s3 = inlined_call_operand.vmem [shape: f32[32,128], index: 3, kind: input, shape index: {}]   ;;  %s1736_s4 = inlined_call_operand.vmem [shape: f32[1,128], index: 4, kind: input, shape index: {}]   ;;  %s1737_s5 = inlined_call_operand.vmem [shape: f32[32,128], index: 5, kind: input, shape index: {}]   ;;  %s1738_s6 = inlined_call_operand.vmem [shape: f32[1,128], index: 6, kind: input, shape index: {}]   ;;  %s1739_s7 = inlined_call_operand.hbm [shape: f32[8,128], index: 7, kind: output, shape index: {}]  }
   0x1   :  { %13 = vsyncpa [#allocation3], 0  ;;  %s1426_s26 = scalar_lea.hbm %s1732_s0, 16 }
   0x2   :  { %p1427_p0 = scmp.ne.s32.totalorder %s1732_s0, %s1426_s26  ;;  %p1430_p1 = scmp.lt.u32.totalorder %s1426_s26, %s1732_s0 }
   0x4   :  { %p1432_p2 = pnand %p1430_p1, %p1427_p0 }
   0x6   :  { %1435 = shalt.err (!%p1432_p2)
}
   0x7   :  { %s1462_s8 = smov [#allocation2]  }
   0x8   :  { %21 = dma.hbm_to_smem %s1732_s0, 16, %s1462_s8, [#allocation4]  }
   0x9   :  { %1458 = dma.done.wait [#allocation4], 16  }
   0xa   :  { %1459 = vsyncadd [#allocation4], 4294967280 }
   0xb   :  { %37 = sfence }
   0xc   :  { %v97_v0 = vld [vmem:[%s1734_s2] sm:$0xff]  ;;  %v98_v1 = vld [vmem:[%s1734_s2 + $0x8] sm:$0xff]  ;;  %v1463_v3 = vmov 0.0|0.0   ;;  %v99_v6 = vld [vmem:[%s1734_s2 + $0x10] sm:$0xff]  ;;  %s1541_s22 = sld [smem:[#allocation2]]  ;;  %vm1464_vm0 = vmmov 0  }
   0xd   :  { %v182_v2 = vld [vmem:[%s1735_s3] sm:$0xff]  ;;  %1311 = vmatprep.subr.bf16.mxu0 %v1463_v3  ;;  %v1312_v4 = vpack.c.bf16 %v98_v1, %v97_v0  ;;  %1317 = vmatprep.subr.bf16.mxu1 %v1463_v3  ;;  %v183_v5 = vld [vmem:[%s1735_s3 + $0x8] sm:$0xff]  ;;  %v100_v7 = vld [vmem:[%s1734_s2 + $0x18] sm:$0xff]  ;;  %v1465_v11 = vmov 0.0   ;;  %s1133_s27 = sld [smem:[#allocation2 + $0x1]]  ;;  %s1134_s2 = sld [smem:[#allocation2 + $0x2]] }
   0xe   :  { %v1543_v8 = vpack.c.bf16 %v183_v5, %v182_v2  ;;  %v184_v9 = vld [vmem:[%s1735_s3 + $0x10] sm:$0xff]  ;;  %v185_v10 = vld [vmem:[%s1735_s3 + $0x18] sm:$0xff]  ;;  %1209 = vmatprep.mubr.msk.f32.mxu0 %vm1464_vm0, %v1465_v11  ;;  %1220 = vmatprep.mubr.msk.f32.mxu1 %vm1464_vm0, %v1465_v11  ;;  %v1315_v12 = vpack.c.bf16 %v100_v7, %v99_v6  ;;  %s1135_s28 = sld [smem:[#allocation2 + $0x3]]  ;;  %s1136_s29 = sld [smem:[#allocation2 + $0x4]]  ;;  %vm83_vm1 = vcmask 1040384   ;;  %vm85_vm2 = vcmask 1041408  }
   0xf   :  { %1313 = vmatpush3.bf16.msra.mxu0 %v1312_v4  ;;  %v1557_v13 = vpack.c.bf16 %v185_v10, %v184_v9  ;;  %s1137_s3 = sld [smem:[#allocation2 + $0x5]]  ;;  %s1138_s30 = sld [smem:[#allocation2 + $0x6]]  ;;  %vm87_vm3 = vcmask 1042432   ;;  %vm89_vm4 = vcmask 1043456   ;;  %vm91_vm5 = vcmask 1044480  }
  0x10   :  { %1319 = vmatpush3.bf16.msra.mxu1 %v1543_v8  ;;  %1314 = vmatprep.subr.bf16.mxu0 %v1463_v3  ;;  %s1139_s8 = sld [smem:[#allocation2 + $0x7]]  ;;  %vm93_vm6 = vcmask 1045504   ;;  %vm95_vm7 = vcmask 1046528   ;;  %vm108_vm8 = vcmask 261120   ;;  %v1140_v38 = vld [vmem:[%s1736_s4] ss:$0 sm:$0xff] }
  0x11   :  { %1320 = vmatprep.subr.bf16.mxu1 %v1463_v3 }
  0x12   :  { %s39_s11 = scalar_lea.vmem %s1733_s1, %s1541_s22 }
  0x13   :  { %1316 = vmatpush3.bf16.msra.mxu0 %v1315_v12  ;;  %s42_s14 = scalar_lea.vmem %s1733_s1, %s1133_s27  ;;  %s45_s0 = scalar_lea.vmem %s1733_s1, %s1134_s2  ;;  %v40_v14 = vld [vmem:[%s39_s11] sm:$0x1] }
  0x14   :  { %1322 = vmatpush3.bf16.msra.mxu1 %v1557_v13  ;;  %1323 = vmatprep.subr.bf16.mxu0 %v1463_v3  ;;  %v43_v15 = vld [vmem:[%s42_s14] sm:$0x1]  ;;  %s48_s19 = scalar_lea.vmem %s1733_s1, %s1135_s28  ;;  %s51_s22 = scalar_lea.vmem %s1733_s1, %s1136_s29 }
  0x15   :  { %v46_v16 = vld [vmem:[%s45_s0] sm:$0x1]  ;;  %1329 = vmatprep.subr.bf16.mxu1 %v1463_v3  ;;  %s54_s25 = scalar_lea.vmem %s1733_s1, %s1137_s3  ;;  %s57_s2 = scalar_lea.vmem %s1733_s1, %s1138_s30  ;;  %v63_v19 = vrot.slane %v43_v15, 7 }
  0x16   :  { %v49_v17 = vld [vmem:[%s48_s19] sm:$0x1]  ;;  %v66_v20 = vrot.slane %v46_v16, 6  ;;  %s60_s29 = scalar_lea.vmem %s1733_s1, %s1139_s8  ;;  %s1466_s30 = smov 64  }
  0x17   :  { %v52_v18 = vld [vmem:[%s51_s22] sm:$0x1]  ;;  %v69_v23 = vrot.slane %v49_v17, 5  ;;  %1221 = vmatmul.mubr.f32.vlgmr.msra.gmra.mrb[0].mxu1 %v1465_v11  ;;  %v84_v27 = vsel %vm83_vm1, %v40_v14, %v63_v19  ;;  %s1467_s8 = smov 32  }
  0x18   :  { %v55_v21 = vld [vmem:[%s54_s25] sm:$0x1]  ;;  %v72_v24 = vrot.slane %v52_v18, 4  ;;  %1331 = vmatpush3.bf16.msra.mxu1 %v1543_v8  ;;  %1242 = vmatprep.mubr.msk.f32.mxu1 %vm1464_vm0, %v1465_v11  ;;  %v86_v29 = vsel %vm85_vm2, %v84_v27, %v66_v20 }
  0x19   :  { %v58_v22 = vld [vmem:[%s57_s2] sm:$0x1]  ;;  %v75_v26 = vrot.slane %v55_v21, 3  ;;  %1332 = vmatprep.subr.bf16.mxu1 %v1463_v3  ;;  %v88_v31 = vsel %vm87_vm3, %v86_v29, %v69_v23 }
  0x1a   :  { %v61_v25 = vld [vmem:[%s60_s29] sm:$0x1]  ;;  %v78_v28 = vrot.slane %v58_v22, 2  ;;  %v90_v32 = vsel %vm89_vm4, %v88_v31, %v72_v24 }
  0x1b   :  { %v81_v30 = vrot.slane %v61_v25, 1  ;;  %v92_v33 = vsel %vm91_vm5, %v90_v32, %v75_v26 }
  0x1c   :  { %1334 = vmatpush3.bf16.msra.mxu1 %v1557_v13  ;;  %v94_v34 = vsel %vm93_vm6, %v92_v33, %v78_v28 }
  0x1d   :  { %1341 = vmatprep.subr.bf16.mxu1 %v1463_v3  ;;  %v96_v35 = vsel %vm95_vm7, %v94_v34, %v81_v30 }
  0x1e   :  { %1210 = vmatmul.mubr.msk.f32.vlgmr.msra.gmra.mrb[0].mxu0 %vm108_vm8, %v96_v35 }
  0x1f   :  { %1325 = vmatpush3.bf16.msra.mxu0 %v1543_v8  ;;  %1231 = vmatprep.mubr.msk.f32.mxu0 %vm1464_vm0, %v1465_v11 }
  0x20   :  { %1326 = vmatprep.subr.bf16.mxu0 %v1463_v3 }
  0x23   :  { %1328 = vmatpush3.bf16.msra.mxu0 %v1557_v13 }
  0x24   :  { %1335 = vmatprep.subr.bf16.mxu0 %v1463_v3 }
  0xea   :  { %v255_v36 = vpop.f32.mrb[0].mxu1 }
  0xeb   :  { %v1222_v37 = vpop.f32.mrb[1].mxu1 }
  0xf1   :  { %v178_v39 = vpop.f32.mrb[0].mxu0 }
  0xf2   :  { %v1612_v40 = vadd.f32 %v1140_v38, %v178_v39  ;;  %v1211_v41 = vpop.f32.mrb[1].mxu0 }
  0xf4   :  { %v259_v42 = vadd.f32 %v255_v36, %v1612_v40 }
  0xf6   :  { %1378 = vtanh.f32 %v259_v42  ;;  %v260_v44 = vmul.f32 0.5, %v259_v42 }
  0xf8   :  { %1380 = vtanh.f32 %v260_v44 }
 0x100   :  { %v1379_v43 = vpop.eup %1378 }
 0x101   :  { %267 = vrot.lane.b32.xlu0 %v1379_v43, %s1466_s30 }
 0x102   :  { %v1381_v45 = vpop.eup %1380 }
 0x103   :  { %v262_v46 = vadd.f32 1.0, %v1381_v45 }
 0x105   :  { %v263_v47 = vmul.f32 0.5, %v262_v46 }
 0x107   :  { %v265_v50 = vmul.f32 0.0, %v263_v47 }
 0x173   :  { %v268_v48 = vpop.permute.xlu0 %267 }
 0x174   :  { %v270_v49 = vmul.f32 %v268_v48, %v263_v47 }
 0x176   :  { %272 = vrot.lane.b32.xlu0 %v270_v49, %s1467_s8 }
 0x1e8   :  { %v273_v51 = vpop.permute.xlu0 %272 }
 0x1e9   :  { %v275_v52 = vadd.f32 %v273_v51, %v265_v50 }
 0x1eb   :  { %1382 = vtanh.f32 %v275_v52  ;;  %v367_v5 = vrot.slane %v275_v52, 7 }
 0x1f5   :  { %v1383_v53 = vpop.eup %1382 }
 0x1f6   :  { %278 = vrot.lane.b32.xlu1 %v1383_v53, %s1466_s30 }
 0x268   :  { %v279_v54 = vpop.permute.xlu1 %278 }
 0x269   :  { %v1618_v55 = vmul.f32 %v279_v54, %v263_v47 }
 0x26b   :  { %283 = vrot.lane.b32.xlu1 %v1618_v55, %s1467_s8 }
 0x2dd   :  { %v284_v56 = vpop.permute.xlu1 %283 }
 0x2de   :  { %1232 = vmatmul.mubr.msk.f32.vlgmr.msra.gmra.mrb[2].mxu0 %vm108_vm8, %v284_v56 }
 0x2df   :  { %1337 = vmatpush3.bf16.msra.mxu0 %v1543_v8  ;;  %1253 = vmatprep.mubr.msk.f32.mxu0 %vm1464_vm0, %v1465_v11 }
 0x2e0   :  { %1338 = vmatprep.subr.bf16.mxu0 %v1463_v3 }
 0x2e3   :  { %1340 = vmatpush3.bf16.msra.mxu0 %v1557_v13 }
 0x2e4   :  { %1347 = vmatprep.subr.bf16.mxu0 %v1463_v3 }
 0x3b1   :  { %v353_v57 = vpop.f32.mrb[2].mxu0 }
 0x3b2   :  { %v358_v58 = vrot.slane %v353_v57, 7  ;;  %v1233_v59 = vpop.f32.mrb[3].mxu0 }
 0x3b4   :  { %v360_v60 = vadd.f32 %v358_v58, %v1612_v40 }
 0x3b6   :  { %1384 = vtanh.f32 %v360_v60  ;;  %v361_v62 = vmul.f32 0.5, %v360_v60 }
 0x3b8   :  { %1386 = vtanh.f32 %v361_v62 }
 0x3c0   :  { %v1385_v61 = vpop.eup %1384 }
 0x3c1   :  { %371 = vrot.lane.b32.xlu0 %v1385_v61, %s1466_s30 }
 0x3c2   :  { %v1387_v63 = vpop.eup %1386 }
 0x3c3   :  { %v363_v0 = vadd.f32 1.0, %v1387_v63 }
 0x3c5   :  { %v364_v1 = vmul.f32 0.5, %v363_v0 }
 0x3c7   :  { %v369_v6 = vmul.f32 %v367_v5, %v364_v1 }
 0x433   :  { %v372_v2 = vpop.permute.xlu0 %371 }
 0x434   :  { %v374_v4 = vmul.f32 %v372_v2, %v364_v1 }
 0x436   :  { %376 = vrot.lane.b32.xlu1 %v374_v4, %s1467_s8 }
 0x4a8   :  { %v377_v7 = vpop.permute.xlu1 %376 }
 0x4a9   :  { %v379_v9 = vadd.f32 %v377_v7, %v369_v6 }
 0x4ab   :  { %1388 = vtanh.f32 %v379_v9  ;;  %v472_v28 = vrot.slane %v379_v9, 7 }
 0x4b5   :  { %v1389_v10 = vpop.eup %1388 }
 0x4b6   :  { %382 = vrot.lane.b32.xlu0 %v1389_v10, %s1466_s30 }
 0x528   :  { %v383_v12 = vpop.permute.xlu0 %382 }
 0x529   :  { %v385_v14 = vmul.f32 %v383_v12, %v364_v1 }
 0x52b   :  { %v387_v15 = vrot.slane %v385_v14, 1  ;;  %v1016_v35 = vsel %vm83_vm1, %v1618_v55, %v385_v14 }
 0x52d   :  { %388 = vrot.lane.b32.xlu1 %v387_v15, %s1467_s8 }
 0x59f   :  { %v389_v16 = vpop.permute.xlu1 %388 }
 0x5a0   :  { %1243 = vmatmul.mubr.msk.f32.vlgmr.msra.gmra.mrb[2].mxu1 %vm108_vm8, %v389_v16 }
 0x5a1   :  { %1343 = vmatpush3.bf16.msra.mxu1 %v1543_v8  ;;  %1264 = vmatprep.mubr.msk.f32.mxu1 %vm1464_vm0, %v1465_v11 }
 0x5a2   :  { %1344 = vmatprep.subr.bf16.mxu1 %v1463_v3 }
 0x5a5   :  { %1346 = vmatpush3.bf16.msra.mxu1 %v1557_v13 }
 0x5a6   :  { %1353 = vmatprep.subr.bf16.mxu1 %v1463_v3 }
 0x673   :  { %v458_v17 = vpop.f32.mrb[2].mxu1 }
 0x674   :  { %v463_v18 = vrot.slane %v458_v17, 6  ;;  %v1244_v19 = vpop.f32.mrb[3].mxu1 }
 0x676   :  { %v465_v20 = vadd.f32 %v463_v18, %v1612_v40 }
 0x678   :  { %1390 = vtanh.f32 %v465_v20  ;;  %v466_v22 = vmul.f32 0.5, %v465_v20 }
 0x67a   :  { %1392 = vtanh.f32 %v466_v22 }
 0x682   :  { %v1391_v21 = vpop.eup %1390 }
 0x683   :  { %476 = vrot.lane.b32.xlu0 %v1391_v21, %s1466_s30 }
 0x684   :  { %v1393_v23 = vpop.eup %1392 }
 0x685   :  { %v468_v24 = vadd.f32 1.0, %v1393_v23 }
 0x687   :  { %v469_v25 = vmul.f32 0.5, %v468_v24 }
 0x689   :  { %v474_v29 = vmul.f32 %v472_v28, %v469_v25 }
 0x6f5   :  { %v477_v26 = vpop.permute.xlu0 %476 }
 0x6f6   :  { %v479_v27 = vmul.f32 %v477_v26, %v469_v25 }
 0x6f8   :  { %481 = vrot.lane.b32.xlu1 %v479_v27, %s1467_s8 }
 0x76a   :  { %v482_v30 = vpop.permute.xlu1 %481 }
 0x76b   :  { %v484_v31 = vadd.f32 %v482_v30, %v474_v29 }
 0x76d   :  { %1394 = vtanh.f32 %v484_v31  ;;  %v577_v51 = vrot.slane %v484_v31, 7 }
 0x777   :  { %v1395_v32 = vpop.eup %1394 }
 0x778   :  { %487 = vrot.lane.b32.xlu0 %v1395_v32, %s1466_s30 }
 0x7ea   :  { %v488_v33 = vpop.permute.xlu0 %487 }
 0x7eb   :  { %v490_v34 = vmul.f32 %v488_v33, %v469_v25 }
 0x7ed   :  { %v492_v36 = vrot.slane %v490_v34, 2  ;;  %v1017_v37 = vsel %vm85_vm2, %v1016_v35, %v490_v34 }
 0x7ef   :  { %493 = vrot.lane.b32.xlu1 %v492_v36, %s1467_s8 }
 0x861   :  { %v494_v38 = vpop.permute.xlu1 %493 }
 0x862   :  { %1254 = vmatmul.mubr.msk.f32.vlgmr.msra.gmra.mrb[4].mxu0 %vm108_vm8, %v494_v38 }
 0x863   :  { %1349 = vmatpush3.bf16.msra.mxu0 %v1543_v8  ;;  %1275 = vmatprep.mubr.msk.f32.mxu0 %vm1464_vm0, %v1465_v11 }
 0x864   :  { %1350 = vmatprep.subr.bf16.mxu0 %v1463_v3 }
 0x867   :  { %1352 = vmatpush3.bf16.msra.mxu0 %v1557_v13 }
 0x868   :  { %1359 = vmatprep.subr.bf16.mxu0 %v1463_v3 }
 0x935   :  { %v563_v39 = vpop.f32.mrb[4].mxu0 }
 0x936   :  { %v568_v41 = vrot.slane %v563_v39, 5  ;;  %v1255_v42 = vpop.f32.mrb[5].mxu0 }
 0x938   :  { %v570_v43 = vadd.f32 %v568_v41, %v1612_v40 }
 0x93a   :  { %1396 = vtanh.f32 %v570_v43  ;;  %v571_v45 = vmul.f32 0.5, %v570_v43 }
 0x93c   :  { %1398 = vtanh.f32 %v571_v45 }
 0x944   :  { %v1397_v44 = vpop.eup %1396 }
 0x945   :  { %581 = vrot.lane.b32.xlu0 %v1397_v44, %s1466_s30 }
 0x946   :  { %v1399_v46 = vpop.eup %1398 }
 0x947   :  { %v573_v47 = vadd.f32 1.0, %v1399_v46 }
 0x949   :  { %v574_v48 = vmul.f32 0.5, %v573_v47 }
 0x94b   :  { %v579_v52 = vmul.f32 %v577_v51, %v574_v48 }
 0x9b7   :  { %v582_v49 = vpop.permute.xlu0 %581 }
 0x9b8   :  { %v584_v50 = vmul.f32 %v582_v49, %v574_v48 }
 0x9ba   :  { %586 = vrot.lane.b32.xlu1 %v584_v50, %s1467_s8 }
 0xa2c   :  { %v587_v53 = vpop.permute.xlu1 %586 }
 0xa2d   :  { %v589_v54 = vadd.f32 %v587_v53, %v579_v52 }
 0xa2f   :  { %1400 = vtanh.f32 %v589_v54  ;;  %v682_v10 = vrot.slane %v589_v54, 7 }
 0xa39   :  { %v1401_v55 = vpop.eup %1400 }
 0xa3a   :  { %592 = vrot.lane.b32.xlu0 %v1401_v55, %s1466_s30 }
 0xaac   :  { %v593_v56 = vpop.permute.xlu0 %592 }
 0xaad   :  { %v595_v57 = vmul.f32 %v593_v56, %v574_v48 }
 0xaaf   :  { %v597_v58 = vrot.slane %v595_v57, 3  ;;  %v1018_v59 = vsel %vm87_vm3, %v1017_v37, %v595_v57 }
 0xab1   :  { %598 = vrot.lane.b32.xlu1 %v597_v58, %s1467_s8 }
 0xb23   :  { %v599_v60 = vpop.permute.xlu1 %598 }
 0xb24   :  { %1265 = vmatmul.mubr.msk.f32.vlgmr.msra.gmra.mrb[4].mxu1 %vm108_vm8, %v599_v60 }
 0xb25   :  { %1355 = vmatpush3.bf16.msra.mxu1 %v1543_v8  ;;  %1286 = vmatprep.mubr.msk.f32.mxu1 %vm1464_vm0, %v1465_v11 }
 0xb26   :  { %1356 = vmatprep.subr.bf16.mxu1 %v1463_v3 }
 0xb29   :  { %1358 = vmatpush3.bf16.msra.mxu1 %v1557_v13 }
 0xb2a   :  { %1365 = vmatprep.subr.bf16.mxu1 %v1463_v3 }
 0xbf7   :  { %v668_v61 = vpop.f32.mrb[4].mxu1 }
 0xbf8   :  { %v673_v62 = vrot.slane %v668_v61, 4  ;;  %v1266_v63 = vpop.f32.mrb[5].mxu1 }
 0xbfa   :  { %v675_v0 = vadd.f32 %v673_v62, %v1612_v40 }
 0xbfc   :  { %1402 = vtanh.f32 %v675_v0  ;;  %v676_v2 = vmul.f32 0.5, %v675_v0 }
 0xbfe   :  { %1404 = vtanh.f32 %v676_v2 }
 0xc06   :  { %v1403_v1 = vpop.eup %1402 }
 0xc07   :  { %686 = vrot.lane.b32.xlu0 %v1403_v1, %s1466_s30 }
 0xc08   :  { %v1405_v4 = vpop.eup %1404 }
 0xc09   :  { %v678_v5 = vadd.f32 1.0, %v1405_v4 }
 0xc0b   :  { %v679_v6 = vmul.f32 0.5, %v678_v5 }
 0xc0d   :  { %v684_v12 = vmul.f32 %v682_v10, %v679_v6 }
 0xc79   :  { %v687_v7 = vpop.permute.xlu0 %686 }
 0xc7a   :  { %v689_v9 = vmul.f32 %v687_v7, %v679_v6 }
 0xc7c   :  { %691 = vrot.lane.b32.xlu1 %v689_v9, %s1467_s8 }
 0xcee   :  { %v692_v14 = vpop.permute.xlu1 %691 }
 0xcef   :  { %v694_v15 = vadd.f32 %v692_v14, %v684_v12 }
 0xcf1   :  { %1406 = vtanh.f32 %v694_v15  ;;  %v787_v32 = vrot.slane %v694_v15, 7 }
 0xcfb   :  { %v1407_v16 = vpop.eup %1406 }
 0xcfc   :  { %697 = vrot.lane.b32.xlu0 %v1407_v16, %s1466_s30 }
 0xd6e   :  { %v698_v17 = vpop.permute.xlu0 %697 }
 0xd6f   :  { %v700_v18 = vmul.f32 %v698_v17, %v679_v6  ;;  %v1024_v17 = vld [vmem:[%s1737_s5 + $0x8] sm:$0xff] }
 0xd71   :  { %v702_v19 = vrot.slane %v700_v18, 4  ;;  %v1019_v20 = vsel %vm89_vm4, %v1018_v59, %v700_v18  ;;  %v1025_v18 = vld [vmem:[%s1737_s5 + $0x10] sm:$0xff] }
 0xd73   :  { %703 = vrot.lane.b32.xlu1 %v702_v19, %s1467_s8 }
 0xde5   :  { %v704_v21 = vpop.permute.xlu1 %703 }
 0xde6   :  { %1276 = vmatmul.mubr.msk.f32.vlgmr.msra.gmra.mrb[6].mxu0 %vm108_vm8, %v704_v21 }
 0xde7   :  { %1361 = vmatpush3.bf16.msra.mxu0 %v1543_v8  ;;  %1297 = vmatprep.mubr.msk.f32.mxu0 %vm1464_vm0, %v1465_v11 }
 0xde8   :  { %1362 = vmatprep.subr.bf16.mxu0 %v1463_v3 }
 0xdeb   :  { %1364 = vmatpush3.bf16.msra.mxu0 %v1557_v13 }
 0xeb9   :  { %v773_v22 = vpop.f32.mrb[6].mxu0 }
 0xeba   :  { %v778_v23 = vrot.slane %v773_v22, 3  ;;  %v1277_v24 = vpop.f32.mrb[7].mxu0 }
 0xebc   :  { %v780_v25 = vadd.f32 %v778_v23, %v1612_v40 }
 0xebe   :  { %1408 = vtanh.f32 %v780_v25  ;;  %v781_v27 = vmul.f32 0.5, %v780_v25 }
 0xec0   :  { %1410 = vtanh.f32 %v781_v27  ;;  %v1149_v27 = vld [vmem:[%s1738_s6] ss:$0 sm:$0xff] }
 0xec8   :  { %v1409_v26 = vpop.eup %1408 }
 0xec9   :  { %791 = vrot.lane.b32.xlu0 %v1409_v26, %s1466_s30 }
 0xeca   :  { %v1411_v28 = vpop.eup %1410 }
 0xecb   :  { %v783_v8 = vadd.f32 1.0, %v1411_v28 }
 0xecd   :  { %v784_v29 = vmul.f32 0.5, %v783_v8 }
 0xecf   :  { %v789_v13 = vmul.f32 %v787_v32, %v784_v29 }
 0xf3b   :  { %v792_v30 = vpop.permute.xlu0 %791 }
 0xf3c   :  { %v794_v31 = vmul.f32 %v792_v30, %v784_v29 }
 0xf3e   :  { %796 = vrot.lane.b32.xlu1 %v794_v31, %s1467_s8 }
 0xfb0   :  { %v797_v33 = vpop.permute.xlu1 %796 }
 0xfb1   :  { %v799_v34 = vadd.f32 %v797_v33, %v789_v13 }
 0xfb3   :  { %1412 = vtanh.f32 %v799_v34  ;;  %v892_v53 = vrot.slane %v799_v34, 7 }
 0xfbd   :  { %v1413_v35 = vpop.eup %1412 }
 0xfbe   :  { %802 = vrot.lane.b32.xlu0 %v1413_v35, %s1466_s30 }
0x1030   :  { %v803_v36 = vpop.permute.xlu0 %802 }
0x1031   :  { %v805_v37 = vmul.f32 %v803_v36, %v784_v29 }
0x1033   :  { %v807_v38 = vrot.slane %v805_v37, 5  ;;  %v1020_v39 = vsel %vm91_vm5, %v1019_v20, %v805_v37  ;;  %v1026_v20 = vld [vmem:[%s1737_s5 + $0x18] sm:$0xff] }
0x1034   :  { %v1369_v21 = vpack.c.bf16 %v1026_v20, %v1025_v18 }
0x1035   :  { %808 = vrot.lane.b32.xlu1 %v807_v38, %s1467_s8 }
0x10a7   :  { %v809_v41 = vpop.permute.xlu1 %808 }
0x10a8   :  { %1287 = vmatmul.mubr.msk.f32.vlgmr.msra.gmra.mrb[6].mxu1 %vm108_vm8, %v809_v41 }
0x10a9   :  { %1308 = vmatprep.mubr.msk.f32.mxu1 %vm1464_vm0, %v1465_v11 }
0x117b   :  { %v878_v42 = vpop.f32.mrb[6].mxu1 }
0x117c   :  { %v883_v43 = vrot.slane %v878_v42, 2  ;;  %v1288_v44 = vpop.f32.mrb[7].mxu1 }
0x117e   :  { %v885_v45 = vadd.f32 %v883_v43, %v1612_v40 }
0x1180   :  { %1414 = vtanh.f32 %v885_v45  ;;  %v886_v47 = vmul.f32 0.5, %v885_v45 }
0x1182   :  { %1416 = vtanh.f32 %v886_v47 }
0x118a   :  { %v1415_v46 = vpop.eup %1414 }
0x118b   :  { %896 = vrot.lane.b32.xlu0 %v1415_v46, %s1466_s30 }
0x118c   :  { %v1417_v48 = vpop.eup %1416 }
0x118d   :  { %v888_v49 = vadd.f32 1.0, %v1417_v48 }
0x118f   :  { %v889_v50 = vmul.f32 0.5, %v888_v49 }
0x1191   :  { %v894_v11 = vmul.f32 %v892_v53, %v889_v50 }
0x11fd   :  { %v897_v51 = vpop.permute.xlu0 %896 }
0x11fe   :  { %v899_v52 = vmul.f32 %v897_v51, %v889_v50 }
0x1200   :  { %901 = vrot.lane.b32.xlu1 %v899_v52, %s1467_s8 }
0x1272   :  { %v902_v54 = vpop.permute.xlu1 %901 }
0x1273   :  { %v904_v55 = vadd.f32 %v902_v54, %v894_v11 }
0x1275   :  { %1418 = vtanh.f32 %v904_v55  ;;  %v997_v12 = vrot.slane %v904_v55, 7 }
0x127f   :  { %v1419_v56 = vpop.eup %1418 }
0x1280   :  { %907 = vrot.lane.b32.xlu0 %v1419_v56, %s1466_s30 }
0x12f2   :  { %v908_v57 = vpop.permute.xlu0 %907 }
0x12f3   :  { %v910_v58 = vmul.f32 %v908_v57, %v889_v50 }
0x12f5   :  { %v912_v59 = vrot.slane %v910_v58, 6  ;;  %v1021_v60 = vsel %vm93_vm6, %v1020_v39, %v910_v58 }
0x12f7   :  { %913 = vrot.lane.b32.xlu1 %v912_v59, %s1467_s8 }
0x1369   :  { %v914_v61 = vpop.permute.xlu1 %913 }
0x136a   :  { %1298 = vmatmul.mubr.msk.f32.vlgmr.msra.gmra.mrb[8].mxu0 %vm108_vm8, %v914_v61 }
0x143d   :  { %v983_v62 = vpop.f32.mrb[8].mxu0 }
0x143e   :  { %v988_v63 = vrot.slane %v983_v62, 1  ;;  %v1299_v0 = vpop.f32.mrb[9].mxu0 }
0x1440   :  { %v990_v1 = vadd.f32 %v988_v63, %v1612_v40  ;;  %v1023_v40 = vld [vmem:[%s1737_s5] sm:$0xff]  ;;  %s1468_s5 = smov [#allocation5]  }
0x1441   :  { %v1366_v19 = vpack.c.bf16 %v1024_v17, %v1023_v40  ;;  %s1116_s18 = sshll.u32 %s1468_s5, 4  ;;  %s1117_s18 = int_to_ptr.vmem [resolvable:$true] %s1116_s18 }
0x1442   :  { %1420 = vtanh.f32 %v990_v1  ;;  %v991_v4 = vmul.f32 0.5, %v990_v1  ;;  %s1436_s19 = scalar_lea.vmem %s1117_s18, 128  ;;  %p1441_p4 = scmp.lt.s32.totalorder %s1117_s18, %s1117_s18 }
0x1443   :  { %1367 = vmatpush3.bf16.msra.mxu1 %v1366_v19  ;;  %p1437_p3 = scmp.ne.s32.totalorder %s1117_s18, %s1436_s19  ;;  %p1442_p5 = scmp.lt.s32.totalorder %s1436_s19, %s1436_s19 }
0x1444   :  { %1422 = vtanh.f32 %v991_v4  ;;  %1368 = vmatprep.subr.bf16.mxu1 %v1463_v3 }
0x1445   :  { %p1443_p6 = por %p1442_p5, %p1441_p4 }
0x1447   :  { %1370 = vmatpush3.bf16.msra.mxu1 %v1369_v21  ;;  %p1444_p7 = pnand %p1443_p6, %p1437_p3 }
0x144c   :  { %v1421_v2 = vpop.eup %1420 }
0x144d   :  { %1001 = vrot.lane.b32.xlu0 %v1421_v2, %s1466_s30 }
0x144e   :  { %v1423_v5 = vpop.eup %1422 }
0x144f   :  { %v993_v6 = vadd.f32 1.0, %v1423_v5 }
0x1451   :  { %v994_v7 = vmul.f32 0.5, %v993_v6 }
0x1453   :  { %v999_v14 = vmul.f32 %v997_v12, %v994_v7 }
0x14bf   :  { %v1002_v9 = vpop.permute.xlu0 %1001 }
0x14c0   :  { %v1004_v10 = vmul.f32 %v1002_v9, %v994_v7 }
0x14c2   :  { %1006 = vrot.lane.b32.xlu1 %v1004_v10, %s1467_s8 }
0x1534   :  { %v1007_v15 = vpop.permute.xlu1 %1006 }
0x1535   :  { %v1009_v16 = vadd.f32 %v1007_v15, %v999_v14 }
0x1537   :  { %1424 = vtanh.f32 %v1009_v16 }
0x1541   :  { %v1425_v22 = vpop.eup %1424 }
0x1542   :  { %1012 = vrot.lane.b32.xlu0 %v1425_v22, %s1466_s30 }
0x15b4   :  { %v1013_v23 = vpop.permute.xlu0 %1012 }
0x15b5   :  { %v1015_v24 = vmul.f32 %v1013_v23, %v994_v7 }
0x15b7   :  { %v1022_v25 = vsel %vm95_vm7, %v1021_v60, %v1015_v24 }
0x15b8   :  { %1035 = vrot.lane.b32.xlu1 %v1022_v25, %s1467_s8 }
0x162a   :  { %v1036_v26 = vpop.permute.xlu1 %1035 }
0x162b   :  { %1309 = vmatmul.mubr.msk.f32.vlgmr.msra.gmra.mrb[8].mxu1 %vm108_vm8, %v1036_v26 }
0x16fe   :  { %v1105_v3 = vpop.f32.mrb[8].mxu1 }
0x16ff   :  { %v1106_v28 = vadd.f32 %v1149_v27, %v1105_v3  ;;  %v1310_v8 = vpop.f32.mrb[9].mxu1 }
0x1701   :  { %1109 = vst [vmem:[#allocation5] sm:$0xff] %v1106_v28 }
0x1702   :  { %1447 = shalt.err (!%p1444_p7)
}
0x1703   :  { %s1448_s22 = scalar_lea.hbm %s1739_s7, 128 }
0x1704   :  { %p1449_p8 = scmp.ne.s32.totalorder %s1739_s7, %s1448_s22  ;;  %p1452_p9 = scmp.lt.u32.totalorder %s1448_s22, %s1739_s7 }
0x1706   :  { %p1454_p10 = pnand %p1452_p9, %p1449_p8 }
0x1708   :  { %1457 = shalt.err (!%p1454_p10)
}
0x1709   :  { %1119 = dma.vmem_to_hbm [thread:$0]  %s1117_s18, 128, %s1739_s7, [#allocation3]  }
0x170a   :  { %1460 = dma.done.wait [#allocation3], 128  }
0x170b   :  { %1461 = vsyncadd [#allocation3], 4294967168 }
0x170c   :  { %1123 = vsyncpa [#allocation3], 1 }
0x170d   :  { %1124 = vsyncpa [#allocation4], 1 }

</bundles_post_ra>
